<compile_context>
chip_gen: v7x
topology: tpu7x:2x2x1
jax: 0.10.0
libtpu: 0.0.40
codegen_flags: <defaults>
</compile_context>

<pallas_src>
import jax
import jax.numpy as jnp
from jax.experimental import pallas as pl
from jax.experimental.pallas import tpu as pltpu

RELU_SLOPE = 0.2
EPS = 1e-5


def _leaky_relu(v):
    return jnp.where(v > 0, v, RELU_SLOPE * v)


def _make_kernel(H, W, Cin, Cout, B_TILE):
    HW = H * W
    Ch = Cout // 2
    pow2_w = (W & (W - 1)) == 0

    def kernel(x_ref, wk1_ref, wk2_ref, wid_ref, scal_ref, out_ref):
        # ---- hoisted once per grid step (shared by all B_TILE samples) ----
        scal = scal_ref[...]                       # (Cout, 8) f32
        b1 = scal[:, 0:1]                          # (Cout, 1)
        b2 = scal[:, 1:2]
        bid = scal[:, 2:3]
        gamma = scal[:, 3:4]                       # padded past Ch (unused there)
        beta = scal[:, 4:5]
        wk1 = wk1_ref[...]                         # (Cout, 9*Cin)  bf16
        wk2 = wk2_ref[...]                         # (Cout, 9*Cout) bf16
        wid = wid_ref[...]                         # (Cout, Cin)    f32

        # Tap-validity masks built in-kernel from a lane iota (no extra inputs).
        iota = jax.lax.broadcasted_iota(jnp.int32, (1, HW), 1)
        col = jnp.bitwise_and(iota, W - 1) if pow2_w else iota % W
        one = jnp.float32(1.0)
        zero = jnp.float32(0.0)
        left_m = jnp.where(col >= 1, one, zero)          # column w-1 valid
        right_m = jnp.where(col <= W - 2, one, zero)     # column w+1 valid
        top_m = jnp.where(iota >= W, one, zero)          # row h-1 valid
        bot_m = jnp.where(iota < HW - W, one, zero)      # row h+1 valid

        # Channel mask for the half-instance-norm masked affine.
        ch = jax.lax.broadcasted_iota(jnp.int32, (Cout, 1), 0)
        in_norm = ch < Ch
        inv_hw = jnp.float32(1.0 / HW)

        def conv3x3(xc, w_packed, b):
            # xc: (Ci, HW) f32.  Build the 9-tap slab with lane rolls (XLU);
            # the whole conv is ONE MXU matmul with K = 9*Ci, bf16 operands,
            # f32 accumulation.
            xl = pltpu.roll(xc, 1, 1) * left_m           # column w-1 (kx=0)
            xr = pltpu.roll(xc, HW - 1, 1) * right_m     # column w+1 (kx=2)
            xcat = jnp.concatenate([xl, xc, xr], axis=0)        # ky=1, (3*Ci, HW)
            up = pltpu.roll(xcat, W, 1) * top_m                 # ky=0 (row h-1)
            down = pltpu.roll(xcat, HW - W, 1) * bot_m          # ky=2 (row h+1)
            full = jnp.concatenate([up, xcat, down], axis=0)    # (9*Ci, HW)
            acc = jnp.dot(w_packed, full.astype(w_packed.dtype),
                          preferred_element_type=jnp.float32)
            return acc + b                                      # (Cout, HW) f32

        # ---- per-sample loop (static unroll; B_TILE kept small by policy) ----
        for b in range(B_TILE):
            x = x_ref[b]                               # (Cin, HW) f32

            # resi = relu_1(conv_1(x))
            resi = _leaky_relu(conv3x3(x, wk1, b1))

            # Half-Instance-Norm as a masked per-channel affine:
            # single-pass stats (E[x^2] - mean^2), no sublane slice/concat.
            s1 = jnp.sum(resi, axis=1, keepdims=True)            # (Cout, 1)
            s2 = jnp.sum(resi * resi, axis=1, keepdims=True)
            mean = s1 * inv_hw
            var = s2 * inv_hw - mean * mean                      # biased var
            scale = gamma * jax.lax.rsqrt(var + EPS)
            s = jnp.where(in_norm, scale, one)
            t = jnp.where(in_norm, beta - mean * scale, zero)
            resi = resi * s + t

            # resi = relu_2(conv_2(resi))
            resi = _leaky_relu(conv3x3(resi, wk2, b2))

            # identity(x) + resi   (1x1 conv, kept in f32: tiny K, exact path)
            ident = jnp.dot(wid, x, preferred_element_type=jnp.float32) + bid
            out_ref[b] = ident + resi

    return kernel


def _pick_b_tile(N, Cin, Cout, HW):
    """Samples per grid step: amortize ~0.35us/step overhead, keep >=2 grid
    steps when N >= 2 (v7x megacore), and stay within a VMEM budget."""
    budget = 8 * 1024 * 1024                       # for double-buffered x/out blocks
    per_sample = (Cin + Cout) * HW * 4 * 2
    cap = max(1, budget // per_sample)
    target = max(1, N // 2) if N >= 2 else 1
    target = min(target, cap)
    b = 1
    for d in range(1, int(target) + 1):            # largest divisor of N <= target
        if N % d == 0:
            b = d
    return b


def hinres_block(x_nchw, params, *, b_tile=None):
    """HinResBlock forward. x_nchw: (N, Cin, H, W) f32 -> (N, Cout, H, W)."""
    N, Cin, H, W = x_nchw.shape
    Cout = params["w_id"].shape[-1]
    Ch = Cout // 2
    HW = H * W

    # NCHW flattens directly to the (C, HW) kernel layout — no transpose glue.
    x_flat = x_nchw.reshape(N, Cin, HW).astype(jnp.float32)

    def pack_w(w):   # HWIO (3,3,Ci,Cout) -> (Cout, 9*Ci), K = ky*3*Ci + kx*Ci + ci
        Ci, Co = w.shape[2], w.shape[3]
        return jnp.transpose(w, (3, 0, 1, 2)).reshape(Co, 9 * Ci)

    wk1 = pack_w(params["w1"]).astype(jnp.bfloat16)              # bf16 MXU operands
    wk2 = pack_w(params["w2"]).astype(jnp.bfloat16)
    wid = jnp.transpose(params["w_id"]).astype(jnp.float32)      # (Cout, Cin)

    zpad = jnp.zeros((Cout - Ch,), jnp.float32)
    zcol = jnp.zeros((Cout,), jnp.float32)
    scal = jnp.stack(
        [params["b1"][0], params["b2"][0], params["b_id"][0],
         jnp.concatenate([params["gamma"][0], zpad]),
         jnp.concatenate([params["beta"][0], zpad]),
         zcol, zcol, zcol], axis=1).astype(jnp.float32)          # (Cout, 8)

    if b_tile is None:
        b_tile = _pick_b_tile(N, Cin, Cout, HW)
    assert N % b_tile == 0, "batch must be divisible by b_tile"
    grid_n = N // b_tile

    out_flat = pl.pallas_call(
        _make_kernel(H, W, Cin, Cout, b_tile),
        out_shape=jax.ShapeDtypeStruct((N, Cout, HW), jnp.float32),
        grid=(grid_n,),
        in_specs=[
            pl.BlockSpec((b_tile, Cin, HW), lambda n: (n, 0, 0)),    # x batch tile
            pl.BlockSpec((Cout, 9 * Cin), lambda n: (0, 0)),         # conv_1 packed w
            pl.BlockSpec((Cout, 9 * Cout), lambda n: (0, 0)),        # conv_2 packed w
            pl.BlockSpec((Cout, Cin), lambda n: (0, 0)),             # identity w
            pl.BlockSpec((Cout, 8), lambda n: (0, 0)),               # scalar pack
        ],
        out_specs=pl.BlockSpec((b_tile, Cout, HW), lambda n: (n, 0, 0)),
        compiler_params=pltpu.CompilerParams(
            dimension_semantics=("parallel",)),
    )(x_flat, wk1, wk2, wid, scal)

    return out_flat.reshape(N, Cout, H, W)


def init_params(key, in_size, out_size):
    """Deterministic synthetic init (shapes follow HinResBlock.__init__)."""
    ks = jax.random.split(key, 8)

    def u(k, shape, scale):
        return jax.random.uniform(k, shape, jnp.float32, -scale, scale)

    s1 = 1.0 / (in_size * 9) ** 0.5
    s2 = 1.0 / (out_size * 9) ** 0.5
    si = 1.0 / in_size ** 0.5
    return dict(
        w1=u(ks[0], (3, 3, in_size, out_size), s1),      # conv_1 (HWIO)
        b1=u(ks[1], (1, out_size), s1),
        w2=u(ks[2], (3, 3, out_size, out_size), s2),     # conv_2 (HWIO)
        b2=u(ks[3], (1, out_size), s2),
        w_id=u(ks[4], (in_size, out_size), si),          # identity 1x1
        b_id=u(ks[5], (1, out_size), si),
        gamma=1.0 + 0.1 * u(ks[6], (1, out_size // 2), 1.0),   # InstanceNorm weight
        beta=0.1 * u(ks[7], (1, out_size // 2), 1.0),          # InstanceNorm bias
    )


def hinres_ref(x, p):
    """Pure-JAX f32 reference matching the PyTorch forward (NCHW)."""
    def conv(inp, w_hwio, b, pad):
        y = jax.lax.conv_general_dilated(
            inp, w_hwio, window_strides=(1, 1),
            padding=((pad, pad), (pad, pad)),
            dimension_numbers=("NCHW", "HWIO", "NCHW"))
        return y + b.reshape(1, -1, 1, 1)

    resi = jax.nn.leaky_relu(conv(x, p["w1"], p["b1"][0], 1), RELU_SLOPE)
    Ch = resi.shape[1] // 2
    o1, o2 = resi[:, :Ch], resi[:, Ch:]
    mean = o1.mean(axis=(2, 3), keepdims=True)
    var = ((o1 - mean) ** 2).mean(axis=(2, 3), keepdims=True)
    o1 = (o1 - mean) / jnp.sqrt(var + EPS)
    o1 = o1 * p["gamma"][0].reshape(1, Ch, 1, 1) + p["beta"][0].reshape(1, Ch, 1, 1)
    resi = jnp.concatenate([o1, o2], axis=1)
    resi = jax.nn.leaky_relu(conv(resi, p["w2"], p["b2"][0], 1), RELU_SLOPE)
    Cin, Cout = p["w_id"].shape
    ident = conv(x, p["w_id"].reshape(1, 1, Cin, Cout), p["b_id"][0], 0)
    return ident + resi


if __name__ == "__main__":
    key = jax.random.PRNGKey(0)
    k_x, k_p = jax.random.split(key)

    in_size = out_size = 4
    N, H, W = 2, 16, 16

    x = jax.random.normal(k_x, (N, in_size, H, W), jnp.float32)
    params = init_params(k_p, in_size, out_size)

    out = hinres_block(x, params)
    out = jax.block_until_ready(out)

    ref = hinres_ref(x, params)
    assert out.shape == ref.shape == (N, out_size, H, W)
    # Tolerance relaxed vs the f32 reference because the 3x3-conv MXU operands
    # are bf16 (f32 accumulation); typical max error at these shapes is ~1e-2.
    max_err = float(jnp.max(jnp.abs(out - ref)))
    if max_err > 5e-2:
        raise AssertionError(f"Pallas kernel mismatch vs reference: {max_err}")

    print("KERNEL_OK")
</pallas_src>

<mosaic_0001>
module attributes {stable_mosaic.version = 11 : i64} {
  func.func @kernel(%arg0: i32, %arg1: memref<1x4x256xf32, #tpu.memory_space<vmem>>, %arg2: memref<4x36xbf16, #tpu.memory_space<vmem>>, %arg3: memref<4x36xbf16, #tpu.memory_space<vmem>>, %arg4: memref<4x4xf32, #tpu.memory_space<vmem>>, %arg5: memref<4x8xf32, #tpu.memory_space<vmem>>, %arg6: memref<1x4x256xf32, #tpu.memory_space<vmem>>) attributes {dimension_semantics = [#tpu.dimension_semantics<parallel>], iteration_bounds = array<i64: 2>, scalar_prefetch = 0 : i64, scratch_operands = 0 : i64, tpu.core_type = #tpu.core_type<tc>, window_params = [{transform_indices = @transform_0, window_bounds = array<i64: 1, 4, 256>}, {pipeline_mode = #tpu.pipeline_mode<synchronous>, transform_indices = @transform_1, window_bounds = array<i64: 4, 36>}, {pipeline_mode = #tpu.pipeline_mode<synchronous>, transform_indices = @transform_2, window_bounds = array<i64: 4, 36>}, {pipeline_mode = #tpu.pipeline_mode<synchronous>, transform_indices = @transform_3, window_bounds = array<i64: 4, 4>}, {pipeline_mode = #tpu.pipeline_mode<synchronous>, transform_indices = @transform_4, window_bounds = array<i64: 4, 8>}, {transform_indices = @transform_5, window_bounds = array<i64: 1, 4, 256>}]} {
    %c0 = arith.constant 0 : index
    %c0_0 = arith.constant 0 : index
    %0 = vector.load %arg5[%c0, %c0_0] : memref<4x8xf32, #tpu.memory_space<vmem>>, vector<4x8xf32>
    %1 = vector.extract_strided_slice %0 {offsets = [0, 0], sizes = [4, 1], strides = [1, 1]} : vector<4x8xf32> to vector<4x1xf32>
    %2 = vector.extract_strided_slice %0 {offsets = [0, 1], sizes = [4, 1], strides = [1, 1]} : vector<4x8xf32> to vector<4x1xf32>
    %3 = vector.extract_strided_slice %0 {offsets = [0, 2], sizes = [4, 1], strides = [1, 1]} : vector<4x8xf32> to vector<4x1xf32>
    %4 = vector.extract_strided_slice %0 {offsets = [0, 3], sizes = [4, 1], strides = [1, 1]} : vector<4x8xf32> to vector<4x1xf32>
    %5 = vector.extract_strided_slice %0 {offsets = [0, 4], sizes = [4, 1], strides = [1, 1]} : vector<4x8xf32> to vector<4x1xf32>
    %c0_1 = arith.constant 0 : index
    %c0_2 = arith.constant 0 : index
    %6 = vector.load %arg2[%c0_1, %c0_2] : memref<4x36xbf16, #tpu.memory_space<vmem>>, vector<4x36xbf16>
    %c0_3 = arith.constant 0 : index
    %c0_4 = arith.constant 0 : index
    %7 = vector.load %arg3[%c0_3, %c0_4] : memref<4x36xbf16, #tpu.memory_space<vmem>>, vector<4x36xbf16>
    %c0_5 = arith.constant 0 : index
    %c0_6 = arith.constant 0 : index
    %8 = vector.load %arg4[%c0_5, %c0_6] : memref<4x4xf32, #tpu.memory_space<vmem>>, vector<4x4xf32>
    %9 = tpu.iota {dimensions = array<i32: 1>} : vector<1x256xi32>
    %c15_i32 = arith.constant 15 : i32
    %10 = vector.broadcast %c15_i32 : i32 to vector<1x256xi32>
    %11 = arith.andi %9, %10 : vector<1x256xi32>
    %c1_i32 = arith.constant 1 : i32
    %12 = vector.broadcast %c1_i32 : i32 to vector<1x256xi32>
    %13 = arith.cmpi sge, %11, %12 : vector<1x256xi32>
    %cst = arith.constant 1.000000e+00 : f32
    %cst_7 = arith.constant 0.000000e+00 : f32
    %14 = vector.broadcast %cst : f32 to vector<1x256xf32>
    %15 = vector.broadcast %cst_7 : f32 to vector<1x256xf32>
    %16 = arith.select %13, %14, %15 : vector<1x256xi1>, vector<1x256xf32>
    %c14_i32 = arith.constant 14 : i32
    %17 = vector.broadcast %c14_i32 : i32 to vector<1x256xi32>
    %18 = arith.cmpi sle, %11, %17 : vector<1x256xi32>
    %cst_8 = arith.constant 1.000000e+00 : f32
    %cst_9 = arith.constant 0.000000e+00 : f32
    %19 = vector.broadcast %cst_8 : f32 to vector<1x256xf32>
    %20 = vector.broadcast %cst_9 : f32 to vector<1x256xf32>
    %21 = arith.select %18, %19, %20 : vector<1x256xi1>, vector<1x256xf32>
    %c16_i32 = arith.constant 16 : i32
    %22 = vector.broadcast %c16_i32 : i32 to vector<1x256xi32>
    %23 = arith.cmpi sge, %9, %22 : vector<1x256xi32>
    %cst_10 = arith.constant 1.000000e+00 : f32
    %cst_11 = arith.constant 0.000000e+00 : f32
    %24 = vector.broadcast %cst_10 : f32 to vector<1x256xf32>
    %25 = vector.broadcast %cst_11 : f32 to vector<1x256xf32>
    %26 = arith.select %23, %24, %25 : vector<1x256xi1>, vector<1x256xf32>
    %c240_i32 = arith.constant 240 : i32
    %27 = vector.broadcast %c240_i32 : i32 to vector<1x256xi32>
    %28 = arith.cmpi slt, %9, %27 : vector<1x256xi32>
    %cst_12 = arith.constant 1.000000e+00 : f32
    %cst_13 = arith.constant 0.000000e+00 : f32
    %29 = vector.broadcast %cst_12 : f32 to vector<1x256xf32>
    %30 = vector.broadcast %cst_13 : f32 to vector<1x256xf32>
    %31 = arith.select %28, %29, %30 : vector<1x256xi1>, vector<1x256xf32>
    %32 = tpu.iota {dimensions = array<i32: 0>} : vector<4x1xi32>
    %c2_i32 = arith.constant 2 : i32
    %33 = vector.broadcast %c2_i32 : i32 to vector<4x1xi32>
    %34 = arith.cmpi slt, %32, %33 : vector<4x1xi32>
    %c0_14 = arith.constant 0 : index
    %c0_15 = arith.constant 0 : index
    %c0_16 = arith.constant 0 : index
    %35 = vector.load %arg1[%c0_14, %c0_15, %c0_16] : memref<1x4x256xf32, #tpu.memory_space<vmem>>, vector<1x4x256xf32>
    %36 = vector.shape_cast %35 : vector<1x4x256xf32> to vector<4x256xf32>
    %c1_i32_17 = arith.constant 1 : i32
    %37 = tpu.dynamic_rotate %36 by %c1_i32_17 dim 1 : vector<4x256xf32>, i32 -> vector<4x256xf32>
    %38 = vector.broadcast %16 : vector<1x256xf32> to vector<4x256xf32>
    %39 = arith.mulf %37, %38 : vector<4x256xf32>
    %c255_i32 = arith.constant 255 : i32
    %40 = tpu.dynamic_rotate %36 by %c255_i32 dim 1 : vector<4x256xf32>, i32 -> vector<4x256xf32>
    %41 = vector.broadcast %21 : vector<1x256xf32> to vector<4x256xf32>
    %42 = arith.mulf %40, %41 : vector<4x256xf32>
    %43 = tpu.concatenate %39, %36, %42 in 0 : vector<4x256xf32>, vector<4x256xf32>, vector<4x256xf32> -> vector<12x256xf32>
    %c16_i32_18 = arith.constant 16 : i32
    %44 = tpu.dynamic_rotate %43 by %c16_i32_18 dim 1 : vector<12x256xf32>, i32 -> vector<12x256xf32>
    %45 = vector.broadcast %26 : vector<1x256xf32> to vector<12x256xf32>
    %46 = arith.mulf %44, %45 : vector<12x256xf32>
    %c240_i32_19 = arith.constant 240 : i32
    %47 = tpu.dynamic_rotate %43 by %c240_i32_19 dim 1 : vector<12x256xf32>, i32 -> vector<12x256xf32>
    %48 = vector.broadcast %31 : vector<1x256xf32> to vector<12x256xf32>
    %49 = arith.mulf %47, %48 : vector<12x256xf32>
    %50 = tpu.concatenate %46, %43, %49 in 0 : vector<12x256xf32>, vector<12x256xf32>, vector<12x256xf32> -> vector<36x256xf32>
    %51 = arith.truncf %50 : vector<36x256xf32> to vector<36x256xbf16>
    %cst_20 = arith.constant dense<0.000000e+00> : vector<4x256xf32>
    %52 = tpu.matmul %6, %51, %cst_20 {dimension_numbers = #tpu.dot_dimension_numbers<[1], [0], [0], [1], [0, 0, 1, 1], [], []>} : vector<4x36xbf16>, vector<36x256xbf16>, vector<4x256xf32> -> vector<4x256xf32>
    %53 = vector.broadcast %1 : vector<4x1xf32> to vector<4x256xf32>
    %54 = arith.addf %52, %53 : vector<4x256xf32>
    %cst_21 = arith.constant 0.000000e+00 : f32
    %55 = vector.broadcast %cst_21 : f32 to vector<4x256xf32>
    %56 = arith.cmpf ogt, %54, %55 : vector<4x256xf32>
    %cst_22 = arith.constant 2.000000e-01 : f32
    %57 = vector.broadcast %cst_22 : f32 to vector<4x256xf32>
    %58 = arith.mulf %57, %54 : vector<4x256xf32>
    %59 = arith.select %56, %54, %58 : vector<4x256xi1>, vector<4x256xf32>
    %cst_23 = arith.constant dense<0.000000e+00> : vector<4xf32>
    %60 = vector.multi_reduction <add>, %59, %cst_23 [1] : vector<4x256xf32> to vector<4xf32>
    %61 = vector.shape_cast %60 : vector<4xf32> to vector<4x1xf32>
    %62 = arith.mulf %59, %59 : vector<4x256xf32>
    %cst_24 = arith.constant dense<0.000000e+00> : vector<4xf32>
    %63 = vector.multi_reduction <add>, %62, %cst_24 [1] : vector<4x256xf32> to vector<4xf32>
    %64 = vector.shape_cast %63 : vector<4xf32> to vector<4x1xf32>
    %cst_25 = arith.constant 3.906250e-03 : f32
    %65 = vector.broadcast %cst_25 : f32 to vector<4x1xf32>
    %66 = arith.mulf %61, %65 : vector<4x1xf32>
    %cst_26 = arith.constant 3.906250e-03 : f32
    %67 = vector.broadcast %cst_26 : f32 to vector<4x1xf32>
    %68 = arith.mulf %64, %67 : vector<4x1xf32>
    %69 = arith.mulf %66, %66 : vector<4x1xf32>
    %70 = arith.subf %68, %69 : vector<4x1xf32>
    %cst_27 = arith.constant 9.99999974E-6 : f32
    %71 = vector.broadcast %cst_27 : f32 to vector<4x1xf32>
    %72 = arith.addf %70, %71 : vector<4x1xf32>
    %73 = math.rsqrt %72 : vector<4x1xf32>
    %74 = arith.mulf %4, %73 : vector<4x1xf32>
    %cst_28 = arith.constant 1.000000e+00 : f32
    %75 = vector.broadcast %cst_28 : f32 to vector<4x1xf32>
    %76 = arith.select %34, %74, %75 : vector<4x1xi1>, vector<4x1xf32>
    %77 = arith.mulf %66, %74 : vector<4x1xf32>
    %78 = arith.subf %5, %77 : vector<4x1xf32>
    %cst_29 = arith.constant 0.000000e+00 : f32
    %79 = vector.broadcast %cst_29 : f32 to vector<4x1xf32>
    %80 = arith.select %34, %78, %79 : vector<4x1xi1>, vector<4x1xf32>
    %81 = vector.broadcast %76 : vector<4x1xf32> to vector<4x256xf32>
    %82 = arith.mulf %59, %81 : vector<4x256xf32>
    %83 = vector.broadcast %80 : vector<4x1xf32> to vector<4x256xf32>
    %84 = arith.addf %82, %83 : vector<4x256xf32>
    %c1_i32_30 = arith.constant 1 : i32
    %85 = tpu.dynamic_rotate %84 by %c1_i32_30 dim 1 : vector<4x256xf32>, i32 -> vector<4x256xf32>
    %86 = vector.broadcast %16 : vector<1x256xf32> to vector<4x256xf32>
    %87 = arith.mulf %85, %86 : vector<4x256xf32>
    %c255_i32_31 = arith.constant 255 : i32
    %88 = tpu.dynamic_rotate %84 by %c255_i32_31 dim 1 : vector<4x256xf32>, i32 -> vector<4x256xf32>
    %89 = vector.broadcast %21 : vector<1x256xf32> to vector<4x256xf32>
    %90 = arith.mulf %88, %89 : vector<4x256xf32>
    %91 = tpu.concatenate %87, %84, %90 in 0 : vector<4x256xf32>, vector<4x256xf32>, vector<4x256xf32> -> vector<12x256xf32>
    %c16_i32_32 = arith.constant 16 : i32
    %92 = tpu.dynamic_rotate %91 by %c16_i32_32 dim 1 : vector<12x256xf32>, i32 -> vector<12x256xf32>
    %93 = vector.broadcast %26 : vector<1x256xf32> to vector<12x256xf32>
    %94 = arith.mulf %92, %93 : vector<12x256xf32>
    %c240_i32_33 = arith.constant 240 : i32
    %95 = tpu.dynamic_rotate %91 by %c240_i32_33 dim 1 : vector<12x256xf32>, i32 -> vector<12x256xf32>
    %96 = vector.broadcast %31 : vector<1x256xf32> to vector<12x256xf32>
    %97 = arith.mulf %95, %96 : vector<12x256xf32>
    %98 = tpu.concatenate %94, %91, %97 in 0 : vector<12x256xf32>, vector<12x256xf32>, vector<12x256xf32> -> vector<36x256xf32>
    %99 = arith.truncf %98 : vector<36x256xf32> to vector<36x256xbf16>
    %cst_34 = arith.constant dense<0.000000e+00> : vector<4x256xf32>
    %100 = tpu.matmul %7, %99, %cst_34 {dimension_numbers = #tpu.dot_dimension_numbers<[1], [0], [0], [1], [0, 0, 1, 1], [], []>} : vector<4x36xbf16>, vector<36x256xbf16>, vector<4x256xf32> -> vector<4x256xf32>
    %101 = vector.broadcast %2 : vector<4x1xf32> to vector<4x256xf32>
    %102 = arith.addf %100, %101 : vector<4x256xf32>
    %cst_35 = arith.constant 0.000000e+00 : f32
    %103 = vector.broadcast %cst_35 : f32 to vector<4x256xf32>
    %104 = arith.cmpf ogt, %102, %103 : vector<4x256xf32>
    %cst_36 = arith.constant 2.000000e-01 : f32
    %105 = vector.broadcast %cst_36 : f32 to vector<4x256xf32>
    %106 = arith.mulf %105, %102 : vector<4x256xf32>
    %107 = arith.select %104, %102, %106 : vector<4x256xi1>, vector<4x256xf32>
    %cst_37 = arith.constant dense<0.000000e+00> : vector<4x256xf32>
    %108 = tpu.matmul %8, %36, %cst_37 {dimension_numbers = #tpu.dot_dimension_numbers<[1], [0], [0], [1], [0, 0, 1, 1], [], []>} : vector<4x4xf32>, vector<4x256xf32>, vector<4x256xf32> -> vector<4x256xf32>
    %109 = vector.broadcast %3 : vector<4x1xf32> to vector<4x256xf32>
    %110 = arith.addf %108, %109 : vector<4x256xf32>
    %111 = arith.addf %110, %107 : vector<4x256xf32>
    %c0_38 = arith.constant 0 : index
    %c0_39 = arith.constant 0 : index
    %c0_40 = arith.constant 0 : index
    %112 = vector.load %arg6[%c0_38, %c0_39, %c0_40] : memref<1x4x256xf32, #tpu.memory_space<vmem>>, vector<1x4x256xf32>
    %113 = vector.shape_cast %112 : vector<1x4x256xf32> to vector<4x256xf32>
    %114 = vector.shape_cast %111 : vector<4x256xf32> to vector<1x4x256xf32>
    tpu.vector_store %arg6[%c0_38, %c0_39, %c0_40], %114 {strides = array<i32>} : memref<1x4x256xf32, #tpu.memory_space<vmem>>, vector<1x4x256xf32>,
    return
  }
  func.func @transform_0(%arg0: i32) -> (i32, i32, i32) {
    %c0_i32 = arith.constant 0 : i32
    %c0_i32_0 = arith.constant 0 : i32
    %c0_i32_1 = arith.constant 0 : i32
    return %arg0, %c0_i32, %c0_i32_0 : i32, i32, i32
  }
  func.func @transform_1(%arg0: i32) -> (i32, i32) {
    %c0_i32 = arith.constant 0 : i32
    %c0_i32_0 = arith.constant 0 : i32
    %c0_i32_1 = arith.constant 0 : i32
    return %c0_i32, %c0_i32_0 : i32, i32
  }
  func.func @transform_2(%arg0: i32) -> (i32, i32) {
    %c0_i32 = arith.constant 0 : i32
    %c0_i32_0 = arith.constant 0 : i32
    %c0_i32_1 = arith.constant 0 : i32
    return %c0_i32, %c0_i32_0 : i32, i32
  }
  func.func @transform_3(%arg0: i32) -> (i32, i32) {
    %c0_i32 = arith.constant 0 : i32
    %c0_i32_0 = arith.constant 0 : i32
    %c0_i32_1 = arith.constant 0 : i32
    return %c0_i32, %c0_i32_0 : i32, i32
  }
  func.func @transform_4(%arg0: i32) -> (i32, i32) {
    %c0_i32 = arith.constant 0 : i32
    %c0_i32_0 = arith.constant 0 : i32
    %c0_i32_1 = arith.constant 0 : i32
    return %c0_i32, %c0_i32_0 : i32, i32
  }
  func.func @transform_5(%arg0: i32) -> (i32, i32, i32) {
    %c0_i32 = arith.constant 0 : i32
    %c0_i32_0 = arith.constant 0 : i32
    %c0_i32_1 = arith.constant 0 : i32
    return %arg0, %c0_i32, %c0_i32_0 : i32, i32, i32
  }
}

</mosaic_0001>

<bundles_post_ra>
// kernel: tpu_custom_call.1
= control target key start
LH: loop header
LB: loop body
LE: loop exit
PB: predicated region body
PF: predicated region fallthrough
CT: control target
= control target key end

     0   :  { %10 = vsyncpa [#allocation3], 0  ;;  %s1450_s0 = inlined_call_operand.hbm [shape: f32[2,4,256], index: 0, kind: input, shape index: {}]   ;;  %s1451_s1 = inlined_call_operand.vmem [shape: bf16[4,36], index: 1, kind: input, shape index: {}]   ;;  %s1452_s2 = inlined_call_operand.hbm [shape: bf16[4,36], index: 2, kind: input, shape index: {}]   ;;  %s1453_s3 = inlined_call_operand.vmem [shape: f32[4,4], index: 3, kind: input, shape index: {}]   ;;  %s1454_s4 = inlined_call_operand.vmem [shape: f32[4,8], index: 4, kind: input, shape index: {}]   ;;  %s1455_s5 = inlined_call_operand.hbm [shape: f32[2,4,256], index: 5, kind: output, shape index: {}]  }
   0x1   :  { %12 = vsyncpa [#allocation3 + $0x1], 0 }
   0x2   :  { %13 = vsyncpa [#allocation6], 0 }
   0x3   :  { %14 = vsyncpa [#allocation4], 0 }
   0x4   :  { %16 = vsyncpa [#allocation4 + $0x1], 0  ;;  %s1067_s18 = smov 0   ;;  %s1069_s19 = smov 0  }
   0x5   :  { %s1071_s20 = smov 0   ;;  %s1073_s21 = smov 0  }
   0x6 LB: > { %s1088_s22 = sadd.s32 4294967295, %s1022_s21   ;;  %s793_s23 = sadd.s32 4294967294, %s1022_s21   ;;  %s1022_s21 = sphi %s1073_s21, %s1479_s21   ;;  %s1018_s20 = sphi %s1071_s20, %s1478_s20   ;;  %s1014_s19 = sphi %s1069_s19, %s1477_s19   ;;  %s1010_s18 = sphi %s1067_s18, %s1476_s18  }
   0x7   : > { %p42_p0 = scmp.ne.s32.totalorder %s1014_s19, %s1010_s18  ;;  %p1456_p1 = scmp.eq.s32.totalorder %s1088_s22, 0 }
   0x8   : > { %p156_p3 = scmp.eq.s32.totalorder %s793_s23, 1  ;;  %p794_p5 = scmp.ge.s32.totalorder %s1022_s21, 1 }
   0x9   : > { %p1097_p4 = por %p1456_p1, %p42_p0  ;;  %p163_p7 = scmp.lt.s32.totalorder %s1022_s21, 3 }
   0xa   : > { %p1102_p6 = por %p156_p3, %p42_p0  ;;  %s1024_s27 = smov [#allocation5]  }
   0xb   : > { %s1459_s24 = scalar_select %p1097_p4, 1, 0 }
   0xc   : > { %s1460_s25 = scalar_select %p1102_p6, 1, 0 }
   0xd   : > { %p1107_p8 = pnand %p794_p5, %p163_p7  ;;  %s179_s28 = sshll.u32 %s1024_s27, 4  ;;  %s180_s28 = int_to_ptr.vmem [resolvable:$true] %s179_s28 }
   0xe   : > { %s1115_s29 = sadd.s32 1, %s1022_s21   ;;  %s29_s8 = sadd.s32 1, %s1018_s20 }
   0xf   : > { %s1461_s26 = scalar_select %p1107_p8, 1, 0 }
  0x10   : > { %p826_p10 = pneg %p1107_p8  ;;  %s26_s6 = ssub.s32 %s1022_s21, %s1115_s29 }
  0x11   : > { %p1125_p12 = scmp.eq.s32.totalorder %s26_s6, 0  ;;  %s894_s11 = scalar_lea.hbm %s1452_s2, 32 }
  0x12   : > { %p1119_p11 = pnand %p826_p10, %p1456_p1  ;;  %p895_p0 = scmp.ne.s32.totalorder %s1452_s2, %s894_s11 }
  0x13   : > { %s1463_s7 = scalar_select %p1125_p12, 1, 0 }
  0x14   : > { %p896_p3 = pneg %p1119_p11  ;;  %p901_p10 = scmp.lt.u32.totalorder %s894_s11, %s1452_s2 }
  0x16   : > { %p897_p5 = pnand %p896_p3, %p895_p0 }
  0x18   : > { %p898_p7 = pneg %p897_p5 }
  0x1a   : > { %p903_p9 = pnand %p901_p10, %p898_p7 }
  0x1c   : > { %906 = shalt.err (!%p903_p9)
}
  0x1d   : > { %s907_s16 = scalar_lea.vmem %s180_s28, 32  ;;  %p915_p6 = scmp.lt.s32.totalorder %s180_s28, %s180_s28 }
  0x1e   : > { %p908_p1 = scmp.ne.s32.totalorder %s180_s28, %s907_s16  ;;  %p916_p4 = scmp.lt.s32.totalorder %s907_s16, %s907_s16 }
  0x20   : > { %p910_p2 = pnand %p908_p1, %p896_p3  ;;  %p917_p8 = por %p916_p4, %p915_p6 }
  0x22   : > { %p911_p13 = pneg %p910_p2 }
  0x24   : > { %p918_p12 = pnand %p917_p8, %p911_p13 }
  0x26   : > { %921 = shalt.err (!%p918_p12)
}
  0x27   : > { %829 = dma.hbm_to_vmem [thread:$0]  (!%p1119_p11), %s1452_s2, 32, %s180_s28, [#allocation6]  }
  0x28   : > { %p1464_p1 = scmp.ne.s32.totalorder %s1463_s7, 0  ;;  %p37_p2 = scmp.eq.s32.totalorder %s1022_s21, 0 }
  0x29   : > { %p1465_p4 = scmp.ne.s32.totalorder %s1018_s20, %s1014_s19  ;;  %p1466_p6 = scmp.eq.s32.totalorder %s1088_s22, 1 }
  0x2a   : > { %s1151_s27 = scalar_select %p1464_p1, %s1018_s20, %s29_s8  }
  0x2b   : > { %p1159_p8 = por %p1466_p6, %p1465_p4  ;;  %p839_p9 = scmp.lt.s32.totalorder %s1022_s21, 2 }
  0x2c   : > { %s196_s6 = sand.u32 1, %s1018_s20   ;;  %p1468_p12 = pmov %p1465_p4 }
  0x2d   : > { %s797_s9 = sshll.u32 %s196_s6, 3  ;;  %s816_s10 = sshll.u32 %s1022_s21, 7 }
  0x2e   : > { %p38_p13 = por %p37_p2, %p1468_p12  ;;  %s1172_s28 = scalar_lea.hbm %s1450_s0, %s816_s10 }
  0x2f   : > { %s200_s7 = scalar_lea.vmem [#allocation2], %s797_s9  ;;  %s197_s14 = scalar_lea.sflag [#allocation3], %s196_s6 }
  0x30   : > { %s208_s8 = sshll.u32 %s200_s7, 4  ;;  %p1174_p11 = pnand %p839_p9, %p38_p13  ;;  %s1178_s8 = int_to_ptr.vmem [resolvable:$true] %s208_s8 }
  0x31   : > { %s922_s15 = scalar_lea.hbm %s1172_s28, 128  ;;  %s927_s23 = scalar_lea.hbm %s1450_s0, 256 }
  0x32   : > { %p923_p0 = scmp.ne.s32.totalorder %s1172_s28, %s922_s15  ;;  %p924_p3 = pneg %p1174_p11 }
  0x33   : > { %p928_p10 = scmp.lt.u32.totalorder %s1172_s28, %s1450_s0  ;;  %p929_p1 = scmp.lt.u32.totalorder %s927_s23, %s922_s15 }
  0x34   : > { %p925_p5 = pnand %p924_p3, %p923_p0  ;;  %p931_p4 = scmp.lt.u32.totalorder %s922_s15, %s1172_s28 }
  0x35   : > { %p930_p2 = por %p929_p1, %p928_p10 }
  0x36   : > { %p926_p7 = pneg %p925_p5 }
  0x37   : > { %p932_p6 = por %p931_p4, %p930_p2 }
  0x39   : > { %p933_p9 = pnand %p932_p6, %p926_p7 }
  0x3b   : > { %936 = shalt.err (!%p933_p9)
}
  0x3c   : > { %s937_s6 = scalar_lea.vmem %s1178_s8, 128  ;;  %s1025_s11 = smov [#allocation2]  }
  0x3d   : > { %p938_p12 = scmp.ne.s32.totalorder %s1178_s8, %s937_s6  ;;  %s942_s12 = sshll.u32 %s1025_s11, 4  ;;  %s943_s12 = int_to_ptr.vmem [resolvable:$false] %s942_s12 }
  0x3e   : > { %s944_s7 = scalar_lea.vmem %s943_s12, 256  ;;  %p945_p5 = scmp.lt.s32.totalorder %s1178_s8, %s943_s12 }
  0x3f   : > { %p940_p13 = pnand %p938_p12, %p924_p3  ;;  %p946_p10 = scmp.lt.s32.totalorder %s944_s7, %s937_s6 }
  0x41   : > { %p941_p0 = pneg %p940_p13  ;;  %p947_p1 = por %p946_p10, %p945_p5 }
  0x43   : > { %p948_p2 = pnand %p947_p1, %p941_p0 }
  0x45   : > { %951 = shalt.err (!%p948_p2)
}
  0x46   : > { %833 = dma.hbm_to_vmem [thread:$0]  (!%p1174_p11), %s1172_s28, 128, %s1178_s8, %s197_s14  }
  0x47   : > { %p1470_p7 = scmp.ne.s32.totalorder %s1461_s26, 0 }
  0x48   : > { %s1208_s15 = sand.u32 (!%p1470_p7), 1, %s1014_s19   ;;  %p1471_p3 = scmp.ne.s32.totalorder (!%p1470_p7), %s1459_s24, 0 }
  0x49   : > { %217 = sbr.rel (%p1470_p7) target bundleno = 1483 (0x5cb), region = 40  ;;  %s801_s16 = sshll.u32 (!%p1470_p7), %s1208_s15, 3 }
  0x4a   : > { %s220_s17 = scalar_lea.sflag (!%p1470_p7), [#allocation3], %s1208_s15  ;;  %s223_s23 = scalar_lea.vmem (!%p1470_p7), [#allocation2], %s801_s16 }
  0x50   : > { %997 = dma.done.wait (%p1471_p3), %s220_s17, 128  }
  0x51   : > { %999 = vsyncadd (%p1471_p3), %s220_s17, 4294967168  ;;  %p1472_p11 = scmp.eq.s32.totalorder %s1088_s22, 0 }
  0x53   : > { %1001 = dma.done.wait (%p1472_p11), [#allocation6], 32   ;;  %p1473_p4 = pmov %p1472_p11 }
  0x54   : > { %v1222_v0 = vld [vmem:[%s223_s23] sm:$0xff]  ;;  %s1026_s26 = smov 127   ;;  %s1027_s28 = smov 1   ;;  %v259_v2 = vlaneseq  ;;  %v1028_v9 = vmov 0.0   ;;  %vm307_vm6 = vcmask 1043456   ;;  %v1030_v33 = vmov 0  }
  0x55   : > { %1003 = vsyncadd (%p1473_p4), [#allocation6], 4294967264  ;;  %296 = vrot.lane.b32.xlu1 %v1222_v0, %s1026_s26  ;;  %287 = vrot.lane.b32.xlu0 %v1222_v0, %s1027_s28  ;;  %v1230_v1 = vcombine.high %v1222_v0, %v1222_v0  ;;  %v305_v16 = vcombine.low %v1222_v0, %v1222_v0  ;;  %s1029_s24 = smov 16   ;;  %s1031_s8 = smov 112   ;;  %v1288_v34 = vld [vmem:[%s1454_s4] sm:$0xf] }
  0x56   : > { %v1237_v3 = vand.u32 127, %v259_v2  ;;  %414 = vmatprep.mubr.bf16.mxu0 %v1030_v33  ;;  %885 = vset.pattern.permute.xlu0 %v1030_v33  ;;  %vm375_vm11 = vcmask 1041408   ;;  %vm371_vm12 = vcmask 293888   ;;  %s817_s12 = sshll.u32 %s1088_s22, 7  ;;  %s253_s7 = scalar_lea.vmem [#allocation7], %s801_s16 }
  0x57   : > { %593 = vmatprep.mubr.bf16.mxu1 %v1030_v33  ;;  %s713_s17 = sshll.u32 %s253_s7, 4  ;;  %s1036_s22 = smov [#allocation7]   ;;  %s1408_s17 = int_to_ptr.vmem [resolvable:$true] %s713_s17 }
  0x58   : > { %v1240_v4 = vadd.s32 128, %v1237_v3  ;;  %v262_v5 = vand.u32 15, %v1237_v3  ;;  %vm300_vm4 = vcmp.lt.s32.totalorder %v1237_v3, 127  ;;  %vm291_vm5 = vcmp.lt.s32.totalorder %v1237_v3, 1  ;;  %s956_s16 = sshll.u32 %s1036_s22, 4  ;;  %s957_s16 = int_to_ptr.vmem [resolvable:$false] %s956_s16 }
  0x59   : > { %298 = vrot.lane.b32.xlu1 %v1230_v1, %s1026_s26  ;;  %289 = vrot.lane.b32.xlu0 %v1230_v1, %s1027_s28  ;;  %vm272_vm7 = vcmp.ge.s32.totalorder %v1237_v3, 16  ;;  %vm318_vm8 = vcmp.lt.s32.totalorder %v1237_v3, 16  ;;  %vm335_vm10 = vcmp.lt.s32.totalorder %v1237_v3, 112  ;;  %s958_s13 = scalar_lea.vmem %s957_s16, 256  ;;  %p959_p13 = scmp.lt.s32.totalorder %s1408_s17, %s957_s16 }
  0x5a   : > { %v263_v6 = vand.u32 15, %v1240_v4  ;;  %vm268_vm0 = vcmp.le.s32.totalorder %v262_v5, 14  ;;  %vm264_vm2 = vcmp.ge.s32.totalorder %v262_v5, 1  ;;  %v1294_v36 = vsel %vm272_vm7, 1.0, %v1028_v9 }
  0x5b   : > { %v1247_v10 = vsel %vm268_vm0, 1.0, %v1028_v9  ;;  %v1253_v12 = vsel %vm264_vm2, 1.0, %v1028_v9  ;;  %vm277_vm9 = vcmp.lt.s32.totalorder %v1240_v4, 240  ;;  %vm612_vm0 = vcmask 31744  }
  0x5c   : > { %vm269_vm1 = vcmp.le.s32.totalorder %v263_v6, 14  ;;  %vm265_vm3 = vcmp.ge.s32.totalorder %v263_v6, 1  ;;  %v1310_v48 = vsel %vm277_vm9, 1.0, %v1028_v9  ;;  %v256_v6 = vld [vmem:[%s1451_s1] sm:$0x3] }
  0x5d   : > { %v1250_v11 = vsel %vm269_vm1, 1.0, %v1028_v9  ;;  %v1256_v13 = vsel %vm265_vm3, 1.0, %v1028_v9 }
  0xc7   : > { %v297_v7 = vpop.permute.xlu1 %296  ;;  %v288_v8 = vpop.permute.xlu0 %287 }
  0xcb   : > { %v299_v14 = vpop.permute.xlu1 %298  ;;  %v290_v15 = vpop.permute.xlu0 %289 }
  0xcc   : > { %v301_v17 = vsel %vm300_vm4, %v297_v7, %v299_v14  ;;  %v302_v18 = vsel %vm300_vm4, %v299_v14, %v297_v7  ;;  %v292_v19 = vsel %vm291_vm5, %v288_v8, %v290_v15  ;;  %v293_v20 = vsel %vm291_vm5, %v290_v15, %v288_v8 }
  0xcd   : > { %v303_v21 = vmul.f32 %v301_v17, %v1247_v10  ;;  %v304_v22 = vmul.f32 %v302_v18, %v1250_v11  ;;  %v294_v23 = vmul.f32 %v293_v20, %v1253_v12  ;;  %v295_v24 = vmul.f32 %v292_v19, %v1256_v13 }
  0xcf   : > { %v350_v25 = vrot.slane %v303_v21, 4  ;;  %v352_v26 = vrot.slane %v304_v22, 4  ;;  %316 = vrot.lane.b32.xlu1 %v304_v22, %s1029_s24  ;;  %312 = vrot.lane.b32.xlu0 %v303_v21, %s1029_s24  ;;  %v308_v27 = vsel %vm307_vm6, %v294_v23, %v305_v16  ;;  %v309_v28 = vsel %vm307_vm6, %v295_v24, %v1222_v0 }
  0xd0   : > { %v348_v29 = vrot.slane %v308_v27, 4  ;;  %v349_v30 = vrot.slane %v309_v28, 4 }
  0xd2   : > { %v351_v31 = vsel %vm307_vm6, %v348_v29, %v350_v25  ;;  %v353_v32 = vsel %vm307_vm6, %v349_v30, %v352_v26 }
  0xd3   : > { %310 = vrot.lane.b32.xlu0 %v308_v27, %s1029_s24  ;;  %314 = vrot.lane.b32.xlu1 %v309_v28, %s1029_s24 }
  0xd7   : > { %327 = vrot.lane.b32.xlu0 %v308_v27, %s1031_s8  ;;  %331 = vrot.lane.b32.xlu1 %v309_v28, %s1031_s8  ;;  %v1032_v28 = vmov 3  }
  0xdb   : > { %329 = vrot.lane.b32.xlu0 %v303_v21, %s1031_s8  ;;  %333 = vrot.lane.b32.xlu1 %v304_v22, %s1031_s8 }
  0xdf   : > { %368 = vperm.xlu0 %885, %v1288_v34  }
  0xe3   : > { %886 = vset.pattern.permute.xlu0 %v1032_v28 }
 0x141   : > { %v317_v35 = vpop.permute.xlu1 %316  ;;  %v313_v37 = vpop.permute.xlu0 %312 }
 0x142   : > { %v322_v38 = vsel %vm318_vm8, %v317_v35, %v313_v37  ;;  %v320_v39 = vsel %vm318_vm8, %v313_v37, %v317_v35 }
 0x143   : > { %v325_v40 = vmul.f32 %v322_v38, %v1294_v36  ;;  %v359_v45 = vsel %vm307_vm6, %v320_v39, %v349_v30  ;;  %v1033_v38 = vmov 4   ;;  %v281_v39 = vshrl.u32 %v259_v2, 7 }
 0x144   : > { %887 = vset.pattern.permute.xlu1 %v1033_v38 }
 0x145   : > { %v315_v41 = vpop.permute.xlu1 %314  ;;  %v311_v42 = vpop.permute.xlu0 %310  ;;  %v358_v49 = vsel %vm307_vm6, %v325_v40, %v348_v29  ;;  %vm282_vm15 = vcmp.lt.s32.totalorder %v281_v39, 2 }
 0x146   : > { %v321_v43 = vsel %vm318_vm8, %v315_v41, %v311_v42  ;;  %v319_v44 = vsel %vm318_vm8, %v311_v42, %v315_v41 }
 0x147   : > { %v323_v46 = vmul.f32 %v321_v43, %v1294_v36  ;;  %v361_v47 = vpack.c.bf16 %v359_v45, %v319_v44 }
 0x149   : > { %v332_v50 = vpop.permute.xlu1 %331  ;;  %382 = vmatprep.subr.bf16.mxu0 %v361_v47  ;;  %v328_v51 = vpop.permute.xlu0 %327  ;;  %v360_v52 = vpack.c.bf16 %v358_v49, %v323_v46 }
 0x14a   : > { %v338_v53 = vsel %vm335_vm10, %v332_v50, %v328_v51  ;;  %v336_v54 = vsel %vm335_vm10, %v328_v51, %v332_v50 }
 0x14b   : > { %v341_v55 = vmul.f32 %v338_v53, %v1310_v48  ;;  %383 = vmatpush1.bf16.msra.mxu0 %v360_v52  ;;  %v362_v59 = vpack.c.bf16 %v336_v54, %v351_v31 }
 0x14d   : > { %v334_v56 = vpop.permute.xlu1 %333  ;;  %v330_v57 = vpop.permute.xlu0 %329  ;;  %v363_v58 = vpack.c.bf16 %v341_v55, %v353_v32 }
 0x14e   : > { %v337_v60 = vsel %vm335_vm10, %v330_v57, %v334_v56  ;;  %v339_v61 = vsel %vm335_vm10, %v334_v56, %v330_v57 }
 0x14f   : > { %v343_v62 = vmul.f32 %v339_v61, %v1310_v48  ;;  %v364_v63 = vpack.c.bf16 %v337_v60, %v337_v60  ;;  %384 = vmatprep.subr.bf16.mxu0 %v363_v58 }
 0x150   : > { %385 = vmatpush1.bf16.msra.mxu0 %v362_v59 }
 0x151   : > { %v365_v4 = vpack.c.bf16 %v343_v62, %v343_v62  ;;  %v377_v5 = vsel %vm375_vm11, %v364_v63, 0 }
 0x153   : > { %804 = vmatprep.subr.msk.bf16.mxu0 %vm375_vm11, %v365_v4 }
 0x154   : > { %387 = vmatpush1.bf16.msra.mxu0 %v377_v5 }
 0x155   : > { %808 = vmatprep.subr.msk.mxu0 %vm307_vm6, %v1230_v1 }
 0x157   : > { %805 = vmatmul.mubr.msk.bf16.vlgmr.msra.gmra.mrb[0].mxu0 %vm371_vm12, %v256_v6 }
 0x158   : > { %809 = vmatpush1.msk.msra.mxu0 %vm307_vm6, %v1222_v0  ;;  %684 = vmatprep.mubr.f32.mxu0 %v1028_v9 }
 0x15e   : > { %v369_v7 = vpop.permute.xlu0 %368 }
 0x22a   : > { %v416_v8 = vpop.f32.mrb[0].mxu0 }
 0x22b   : > { %v417_v14 = vadd.f32 %v416_v8, %v369_v7  ;;  %v418_v15 = vpop.f32.mrb[1].mxu0 }
 0x22c   : > { %v419_v16 = vadd.f32 %v418_v15, %v369_v7  ;;  %v420_v17 = vpop.f32.mrb[2].mxu0 }
 0x22d   : > { %vm423_vm13 = vcmp.gt.f32.partialorder %v417_v14, 0.0  ;;  %v425_v18 = vmul.f32 0.2, %v417_v14  ;;  %v421_v19 = vpop.f32.mrb[3].mxu0 }
 0x22e   : > { %vm424_vm14 = vcmp.gt.f32.partialorder %v419_v16, 0.0  ;;  %v426_v20 = vmul.f32 0.2, %v419_v16 }
 0x22f   : > { %v427_v21 = vsel %vm423_vm13, %v417_v14, %v425_v18  ;;  %v1035_v18 = vmov 2  }
 0x230   : > { %v428_v1 = vsel %vm424_vm14, %v419_v16, %v426_v20  ;;  %v429_v22 = vsel %vm307_vm6, %v427_v21, 0.0  ;;  %v434_v23 = vmul.f32 %v427_v21, %v427_v21 }
 0x231   : > { %v430_v0 = vsel %vm307_vm6, %v428_v1, 0.0  ;;  %v435_v24 = vmul.f32 %v428_v1, %v428_v1 }
 0x232   : > { %v431_v9 = vadd.f32 %v430_v0, %v429_v22  ;;  %v436_v25 = vsel %vm307_vm6, %v434_v23, 0.0 }
 0x233   : > { %v437_v26 = vsel %vm307_vm6, %v435_v24, 0.0 }
 0x234   : > { %432 = vadd.xlane.f32.xlu1 %v431_v9  ;;  %v438_v27 = vadd.f32 %v437_v26, %v436_v25 }
 0x236   : > { %439 = vadd.xlane.f32.xlu0 %v438_v27 }
 0x2c1   : > { %v433_v29 = vpop.xlane.xlu1 %432 }
 0x2c2   : > { %v441_v30 = vmul.f32 0.00390625, %v433_v29 }
 0x2c3   : > { %v440_v31 = vpop.xlane.xlu0 %439 }
 0x2c4   : > { %v443_v32 = vmul.f32 %v441_v30, %v441_v30  ;;  %v442_v33 = vmul.f32 0.00390625, %v440_v31 }
 0x2c6   : > { %v444_v35 = vsub.f32 %v442_v33, %v443_v32 }
 0x2c8   : > { %v445_v37 = vadd.f32 1e-05, %v444_v35 }
 0x2ca   : > { %892 = vrsqrt.f32 %v445_v37 }
 0x2d4   : > { %v893_v40 = vpop.eup %892 }
 0x2d5   : > { %v447_v41 = vmul.f32 %v893_v40, %v1288_v34 }
 0x2d7   : > { %v448_v42 = vsel %vm282_vm15, %v447_v41, 1.0  ;;  %v449_v43 = vmul.f32 %v447_v41, %v441_v30 }
 0x2d8   : > { %458 = vperm.xlu0 %886, %v448_v42  }
 0x2d9   : > { %451 = vrot.lane.b32.xlu1 %v449_v43, %s1027_s28 }
 0x2dc   : > { %889 = vset.pattern.permute.xlu0 %v1035_v18 }
 0x34b   : > { %v452_v44 = vpop.permute.xlu1 %451 }
 0x34c   : > { %v454_v45 = vsub.f32 %v1288_v34, %v452_v44 }
 0x34e   : > { %v455_v46 = vsel %vm282_vm15, %v454_v45, 0.0  ;;  %v257_v45 = vld [vmem:[#allocation5] sm:$0x3] }
 0x34f   : > { %465 = vperm.xlu1 %887, %v455_v46  }
 0x357   : > { %v459_v47 = vpop.permute.xlu0 %458 }
 0x358   : > { %v461_v49 = vmul.f32 %v459_v47, %v427_v21  ;;  %v462_v52 = vmul.f32 %v459_v47, %v428_v1 }
 0x3ce   : > { %v466_v50 = vpop.permute.xlu1 %465 }
 0x3cf   : > { %v468_v51 = vadd.f32 %v466_v50, %v461_v49  ;;  %v469_v2 = vadd.f32 %v466_v50, %v462_v52 }
 0x3d1   : > { %470 = vrot.lane.b32.xlu1 %v468_v51, %s1027_s28  ;;  %v489_v58 = vrot.slane %v469_v2, 4  ;;  %v488_v62 = vrot.slane %v468_v51, 4 }
 0x3d5   : > { %472 = vrot.lane.b32.xlu1 %v469_v2, %s1027_s28  ;;  %s1406_s28 = scalar_lea.hbm %s1455_s5, %s817_s12 }
 0x3d9   : > { %478 = vrot.lane.b32.xlu1 %v468_v51, %s1026_s26 }
 0x3dd   : > { %480 = vrot.lane.b32.xlu1 %v469_v2, %s1026_s26 }
 0x443   : > { %v471_v53 = vpop.permute.xlu1 %470 }
 0x447   : > { %v473_v54 = vpop.permute.xlu1 %472 }
 0x448   : > { %v474_v55 = vsel %vm291_vm5, %v471_v53, %v473_v54  ;;  %v475_v56 = vsel %vm291_vm5, %v473_v54, %v471_v53 }
 0x449   : > { %v477_v57 = vmul.f32 %v474_v55, %v1256_v13  ;;  %v476_v61 = vmul.f32 %v475_v56, %v1253_v12 }
 0x44b   : > { %v479_v59 = vpop.permute.xlu1 %478  ;;  %v493_v60 = vsel %vm307_vm6, %v477_v57, %v489_v58  ;;  %v492_v13 = vsel %vm307_vm6, %v476_v61, %v488_v62 }
 0x44c   : > { %498 = vrot.lane.b32.xlu0 %v493_v60, %s1029_s24  ;;  %v531_v8 = vrot.slane %v493_v60, 4  ;;  %v530_v15 = vrot.slane %v492_v13, 4 }
 0x44f   : > { %v481_v63 = vpop.permute.xlu1 %480 }
 0x450   : > { %v482_v4 = vsel %vm300_vm4, %v479_v59, %v481_v63  ;;  %v483_v5 = vsel %vm300_vm4, %v481_v63, %v479_v59  ;;  %514 = vrot.lane.b32.xlu0 %v493_v60, %s1031_s8 }
 0x451   : > { %v484_v6 = vmul.f32 %v482_v4, %v1247_v10  ;;  %v485_v7 = vmul.f32 %v483_v5, %v1250_v11  ;;  %v258_v10 = vld [vmem:[%s1453_s3] sm:$0xf]  ;;  %v1034_v11 = vmov 1  }
 0x452   : > { %810 = vmatmul.mubr.msk.f32.vlgmr.msra.gmra.mrb[4].mxu0 %vm612_vm0, %v258_v10  ;;  %888 = vset.pattern.permute.xlu1 %v1034_v11 }
 0x453   : > { %v532_v12 = vrot.slane %v484_v6, 4  ;;  %v534_v14 = vrot.slane %v485_v7, 4  ;;  %496 = vrot.lane.b32.xlu1 %v484_v6, %s1029_s24 }
 0x454   : > { %516 = vrot.lane.b32.xlu0 %v485_v7, %s1031_s8 }
 0x455   : > { %v533_v16 = vsel %vm307_vm6, %v530_v15, %v532_v12  ;;  %v535_v17 = vsel %vm307_vm6, %v531_v8, %v534_v14 }
 0x457   : > { %500 = vrot.lane.b32.xlu1 %v485_v7, %s1029_s24 }
 0x458   : > { %609 = vperm.xlu0 %889, %v1288_v34  }
 0x45b   : > { %494 = vrot.lane.b32.xlu1 %v492_v13, %s1029_s24  ;;  %s699_s24 = scalar_lea.sflag [#allocation4], %s1208_s15 }
 0x45f   : > { %510 = vrot.lane.b32.xlu1 %v492_v13, %s1031_s8 }
 0x463   : > { %512 = vrot.lane.b32.xlu1 %v484_v6, %s1031_s8  ;;  %s952_s8 = scalar_lea.vmem %s1408_s17, 128 }
 0x464   : > { %p953_p6 = scmp.ne.s32.totalorder %s1408_s17, %s952_s8  ;;  %p960_p0 = scmp.lt.s32.totalorder %s958_s13, %s952_s8 }
 0x466   : > { %p954_p9 = pnand %p953_p6, %p1159_p8  ;;  %p961_p5 = por %p960_p0, %p959_p13 }
 0x467   : > { %549 = vperm.xlu1 %888, %v1288_v34  }
 0x468   : > { %p955_p12 = pneg %p954_p9 }
 0x46a   : > { %p962_p10 = pnand %p961_p5, %p955_p12 }
 0x4be   : > { %v499_v20 = vpop.permute.xlu0 %498 }
 0x4c2   : > { %v515_v25 = vpop.permute.xlu0 %514 }
 0x4c5   : > { %v497_v19 = vpop.permute.xlu1 %496 }
 0x4c6   : > { %v517_v35 = vpop.permute.xlu0 %516 }
 0x4c9   : > { %v501_v21 = vpop.permute.xlu1 %500 }
 0x4ca   : > { %v505_v1 = vsel %vm318_vm8, %v501_v21, %v497_v19  ;;  %v503_v22 = vsel %vm318_vm8, %v497_v19, %v501_v21 }
 0x4cb   : > { %v508_v23 = vmul.f32 %v505_v1, %v1294_v36  ;;  %v541_v34 = vsel %vm307_vm6, %v503_v22, %v531_v8 }
 0x4cd   : > { %v495_v0 = vpop.permute.xlu1 %494  ;;  %v540_v28 = vsel %vm307_vm6, %v508_v23, %v530_v15 }
 0x4ce   : > { %v504_v24 = vsel %vm318_vm8, %v499_v20, %v495_v0  ;;  %v502_v9 = vsel %vm318_vm8, %v495_v0, %v499_v20 }
 0x4cf   : > { %v506_v26 = vmul.f32 %v504_v24, %v1294_v36  ;;  %v543_v27 = vpack.c.bf16 %v541_v34, %v502_v9 }
 0x4d1   : > { %561 = vmatprep.subr.bf16.mxu1 %v543_v27  ;;  %v511_v29 = vpop.permute.xlu1 %510  ;;  %v542_v30 = vpack.c.bf16 %v540_v28, %v506_v26 }
 0x4d2   : > { %v520_v31 = vsel %vm335_vm10, %v515_v25, %v511_v29  ;;  %v518_v32 = vsel %vm335_vm10, %v511_v29, %v515_v25 }
 0x4d3   : > { %v523_v33 = vmul.f32 %v520_v31, %v1310_v48  ;;  %562 = vmatpush1.bf16.msra.mxu1 %v542_v30  ;;  %v544_v39 = vpack.c.bf16 %v518_v32, %v533_v16 }
 0x4d5   : > { %v513_v37 = vpop.permute.xlu1 %512  ;;  %v545_v38 = vpack.c.bf16 %v523_v33, %v535_v17 }
 0x4d6   : > { %v519_v36 = vsel %vm335_vm10, %v513_v37, %v517_v35  ;;  %v521_v40 = vsel %vm335_vm10, %v517_v35, %v513_v37 }
 0x4d7   : > { %v525_v41 = vmul.f32 %v521_v40, %v1310_v48  ;;  %v546_v42 = vpack.c.bf16 %v519_v36, %v519_v36  ;;  %563 = vmatprep.subr.bf16.mxu1 %v545_v38  ;;  %v610_v50 = vpop.permute.xlu0 %609 }
 0x4d8   : > { %564 = vmatpush1.bf16.msra.mxu1 %v544_v39 }
 0x4d9   : > { %v547_v43 = vpack.c.bf16 %v525_v41, %v525_v41  ;;  %v556_v44 = vsel %vm375_vm11, %v546_v42, 0 }
 0x4db   : > { %806 = vmatprep.subr.msk.bf16.mxu1 %vm375_vm11, %v547_v43 }
 0x4dc   : > { %566 = vmatpush1.bf16.msra.mxu1 %v556_v44 }
 0x4df   : > { %807 = vmatmul.mubr.msk.bf16.vlgmr.msra.gmra.mrb[0].mxu1 %vm371_vm12, %v257_v45 }
 0x4e6   : > { %v550_v49 = vpop.permute.xlu1 %549 }
 0x525   : > { %v686_v46 = vpop.f32.mrb[4].mxu0 }
 0x526   : > { %v688_v47 = vpop.f32.mrb[5].mxu0  ;;  %v687_v53 = vadd.f32 %v686_v46, %v610_v50 }
 0x527   : > { %v689_v55 = vadd.f32 %v688_v47, %v610_v50 }
 0x5b2   : > { %v595_v3 = vpop.f32.mrb[0].mxu1 }
 0x5b3   : > { %v596_v48 = vadd.f32 %v595_v3, %v550_v49  ;;  %v597_v51 = vpop.f32.mrb[1].mxu1 }
 0x5b4   : > { %v598_v52 = vadd.f32 %v597_v51, %v550_v49  ;;  %v599_v2 = vpop.f32.mrb[2].mxu1 }
 0x5b5   : > { %vm602_vm1 = vcmp.gt.f32.partialorder %v596_v48, 0.0  ;;  %v604_v54 = vmul.f32 0.2, %v596_v48  ;;  %v600_v56 = vpop.f32.mrb[3].mxu1 }
 0x5b6   : > { %vm603_vm2 = vcmp.gt.f32.partialorder %v598_v52, 0.0  ;;  %v605_v57 = vmul.f32 0.2, %v598_v52 }
 0x5b7   : > { %v606_v58 = vsel %vm602_vm1, %v596_v48, %v604_v54 }
 0x5b8   : > { %v607_v59 = vsel %vm603_vm2, %v598_v52, %v605_v57  ;;  %v691_v60 = vadd.f32 %v687_v53, %v606_v58 }
 0x5b9   : > { %v692_v61 = vadd.f32 %v689_v55, %v607_v59 }
 0x5bb   : > { %v695_v62 = vcombine.low %v691_v60, %v692_v61 }
 0x5bd   : > { %697 = vst [vmem:[%s253_s7] sm:$0xff] %v695_v62 }
 0x5be   : > { %965 = shalt.err (!%p962_p10)
}
 0x5bf   : > { %s966_s15 = scalar_lea.hbm %s1406_s28, 128  ;;  %s970_s10 = scalar_lea.hbm %s1455_s5, 256 }
 0x5c0   : > { %p967_p1 = scmp.ne.s32.totalorder %s1406_s28, %s966_s15  ;;  %p971_p3 = scmp.lt.u32.totalorder %s1406_s28, %s1455_s5 }
 0x5c1   : > { %p972_p11 = scmp.lt.u32.totalorder %s970_s10, %s966_s15  ;;  %p974_p6 = scmp.lt.u32.totalorder %s966_s15, %s1406_s28 }
 0x5c2   : > { %p968_p2 = pnand %p967_p1, %p1159_p8 }
 0x5c3   : > { %p973_p4 = por %p972_p11, %p971_p3 }
 0x5c4   : > { %p969_p7 = pneg %p968_p2 }
 0x5c5   : > { %p975_p9 = por %p974_p6, %p973_p4 }
 0x5c7   : > { %p976_p12 = pnand %p975_p9, %p969_p7 }
 0x5c9   : > { %979 = shalt.err (!%p976_p12)
}
 0x5ca   : > { %824 = dma.vmem_to_hbm [thread:$0]  (%p1159_p8), %s1408_s17, 128, %s1406_s28, %s699_s24  }
 0x5cb PF: > { %s725_s12 = sand.u32 1, %s1010_s18   ;;  %p1474_p13 = scmp.ne.s32.totalorder %s1460_s25, 0 }
 0x5cc   : > { %p1475_p0 = scmp.ge.s32.totalorder %s1022_s21, 2  ;;  %s726_s7 = scalar_lea.sflag [#allocation4], %s725_s12 }
 0x5ce   : > { %p835_p5 = pnand %p1475_p0, %p1474_p13 }
 0x5d0   : > { %1005 = dma.done.wait (!%p835_p5), %s726_s7, 128  }
 0x5d1   : > { %1007 = vsyncadd (!%p835_p5), %s726_s7, 4294967168  ;;  %p19_p10 = scmp.ge.s32.totalorder %s1115_s29, 4   ;;  %s1476_s18 = smov %s1014_s19 }
 0x5d2   : > { %s1477_s19 = smov %s1018_s20  ;;  %s1478_s20 = smov %s1151_s27 }
 0x5d3   : > { %s1479_s21 = smov %s1115_s29  ;;  %21 = sbr.rel (!%p19_p10) target bundleno = 6 (0x6), region = 89 }
 0x5da   :  { %731 = vsyncpa [#allocation3], 1 }
 0x5db   :  { %733 = vsyncpa [#allocation3 + $0x1], 1 }
 0x5dc   :  { %734 = vsyncpa [#allocation6], 1 }
 0x5dd   :  { %735 = vsyncpa [#allocation4], 1 }
 0x5de   :  { %737 = vsyncpa [#allocation4 + $0x1], 1 }

</bundles_post_ra>
